<compile_context>
chip_gen: v7x
topology: tpu7x:2x2x1
jax: 0.10.0
libtpu: 0.0.40
codegen_flags: <defaults>
</compile_context>

<pallas_src>
import jax
import jax.numpy as jnp
from jax import lax
from jax.experimental import pallas as pl
from jax.experimental.pallas import tpu as pltpu


def _round_up(n, m):
    return ((n + m - 1) // m) * m


def _mlp_kernel(x_ref, w1_ref, b1_ref, w2_ref, b2_ref, w3_ref, b3_ref, o_ref):
    """One batch tile: x_ref (TB, 19) f32 -> o_ref (19, TB) f32 (feature-major).

    Weights arrive feature-major bf16: w1 (64, 19), w2 (48, 64), w3 (19, 48);
    biases are f32 column vectors (F, 1). All dots accumulate in f32; the batch
    axis stays on the lane dimension, so every VPU op and the store is lane-dense.
    """
    x = x_ref[...].astype(jnp.bfloat16)                              # (TB, 19)
    # h1^T = W1t contracted with x over their *last* dims -> the transpose of x is
    # absorbed by the MXU operand feed rather than materialized as a relayout.
    h1 = lax.dot_general(
        w1_ref[...], x,
        dimension_numbers=(((1,), (1,)), ((), ())),
        preferred_element_type=jnp.float32)                          # (64, TB)
    h1 = jnp.maximum(h1 + b1_ref[...], 0.0)
    h2 = jnp.dot(w2_ref[...], h1.astype(jnp.bfloat16),
                 preferred_element_type=jnp.float32)                 # (48, TB)
    h2 = jnp.maximum(h2 + b2_ref[...], 0.0)
    y = jnp.dot(w3_ref[...], h2.astype(jnp.bfloat16),
                preferred_element_type=jnp.float32)                  # (19, TB)
    o_ref[...] = (y + b3_ref[...]).astype(o_ref.dtype)


def generator_forward(x, params, *, block_b=2048, feature_major_out=False):
    """Forward pass of Generator.

    x: (B, 19) float32.
    Returns (B, 19) float32 (PyTorch layout), or (19, B) if feature_major_out=True
    (skips the wrapper-side transpose — an extra HBM round-trip of the output).
    """
    B, in_dim = x.shape
    w1, w2, w3 = params["w1"], params["w2"], params["w3"]
    b1, b2, b3 = params["b1"], params["b2"], params["b3"]
    h1_dim, h2_dim, out_dim = w1.shape[1], w2.shape[1], w3.shape[1]

    # Feature-major bf16 weights + f32 column biases (tiny; cast once per call).
    w1t = w1.T.astype(jnp.bfloat16)                  # (64, 19)
    w2t = w2.T.astype(jnp.bfloat16)                  # (48, 64)
    w3t = w3.T.astype(jnp.bfloat16)                  # (19, 48)
    b1c = b1.reshape(h1_dim, 1).astype(jnp.float32)
    b2c = b2.reshape(h2_dim, 1).astype(jnp.float32)
    b3c = b3.reshape(out_dim, 1).astype(jnp.float32)

    # Batch tile TB: multiple of 128 (sublane-aligned for the (TB, 19) input block,
    # lane-dense for the (19, TB) output block). Large enough to amortize per-step
    # overhead, but capped so the grid keeps >= ~min_steps steps for mid/large B
    # (the "parallel" grid axis is what feeds both TensorCores on v7x).
    min_steps = 8
    tb = _round_up(max(1, (B + min_steps - 1) // min_steps), 128)
    tb = min(tb, _round_up(max(block_b, 128), 128))
    b_pad = _round_up(B, tb)
    if b_pad != B:
        x = jnp.pad(x, ((0, b_pad - B), (0, 0)))
    grid = (b_pad // tb,)

    # Invariant operands use constant index maps: Pallas keeps the same VMEM block
    # across all grid steps instead of re-issuing DMAs per step.
    const2d = lambda shape: pl.BlockSpec(shape, lambda i: (0, 0))

    weight_elems = in_dim * h1_dim + h1_dim * h2_dim + h2_dim * out_dim
    flops = 2 * b_pad * weight_elems
    bytes_accessed = (b_pad * in_dim * 4            # x (f32 in)
                      + b_pad * out_dim * 4         # y^T (f32 out)
                      + 2 * weight_elems            # bf16 weights
                      + 4 * (h1_dim + h2_dim + out_dim))  # f32 biases

    # Only state a VMEM budget explicitly when the tile sweep goes big enough to
    # threaten the scoped default (v5e: 16 MiB, v6e/v7x: 32 MiB).
    vmem_limit_bytes = None
    if tb > 8192:
        live = (4 * tb * (h1_dim + h2_dim + out_dim)     # f32 intermediates
                + 2 * (4 * tb * in_dim)                  # double-buffered x tiles
                + 2 * (4 * tb * out_dim)                 # double-buffered out tiles
                + (1 << 20))                             # weights/biases + slack
        vmem_limit_bytes = min(_round_up(live, 1 << 20) + (8 << 20), 64 << 20)

    out_t = pl.pallas_call(
        _mlp_kernel,
        out_shape=jax.ShapeDtypeStruct((out_dim, b_pad), jnp.float32),
        grid=grid,
        in_specs=[
            # NOTE: if the x fetch is still exposed on v5e, pipeline_mode=pl.Buffered(3)
            # here buys one more in-flight fetch for tb*19*4 extra bytes of VMEM.
            pl.BlockSpec((tb, in_dim), lambda i: (i, 0)),   # batch tile of x
            const2d(w1t.shape), const2d(b1c.shape),
            const2d(w2t.shape), const2d(b2c.shape),
            const2d(w3t.shape), const2d(b3c.shape),
        ],
        out_specs=pl.BlockSpec((out_dim, tb), lambda i: (0, i)),
        compiler_params=pltpu.CompilerParams(
            dimension_semantics=("parallel",),              # megacore / v7x 2-TC sharding
            vmem_limit_bytes=vmem_limit_bytes),
        cost_estimate=pl.CostEstimate(
            flops=flops, transcendentals=0, bytes_accessed=bytes_accessed),
    )(x, w1t, b1c, w2t, b2c, w3t, b3c)

    if feature_major_out:
        return out_t[:, :B]                 # (19, B): no extra HBM round-trip
    # Back to PyTorch (batch, features) layout, dropping batch padding.
    return out_t.T[:B]


def init_params(key):
    """Deterministic init mimicking PyTorch nn.Linear default (uniform +-1/sqrt(fan_in))."""
    dims = [(19, 64), (64, 48), (48, 19)]
    params = {}
    for i, (fan_in, fan_out) in enumerate(dims, start=1):
        key, kw, kb = jax.random.split(key, 3)
        bound = 1.0 / jnp.sqrt(jnp.float32(fan_in))
        params[f"w{i}"] = jax.random.uniform(
            kw, (fan_in, fan_out), jnp.float32, minval=-bound, maxval=bound)
        params[f"b{i}"] = jax.random.uniform(
            kb, (1, fan_out), jnp.float32, minval=-bound, maxval=bound)
    return params


def _reference(x, p):
    """Pure-JAX reference mirroring the kernel's bf16-weight / f32-accumulate math."""
    w1 = p["w1"].astype(jnp.bfloat16)
    w2 = p["w2"].astype(jnp.bfloat16)
    w3 = p["w3"].astype(jnp.bfloat16)
    h1 = jnp.maximum(
        jnp.dot(x.astype(jnp.bfloat16), w1, preferred_element_type=jnp.float32) + p["b1"], 0.0)
    h2 = jnp.maximum(
        jnp.dot(h1.astype(jnp.bfloat16), w2, preferred_element_type=jnp.float32) + p["b2"], 0.0)
    return jnp.dot(h2.astype(jnp.bfloat16), w3, preferred_element_type=jnp.float32) + p["b3"]


if __name__ == "__main__":
    key = jax.random.PRNGKey(0)
    key, kx = jax.random.split(key)
    params = init_params(key)

    # Small single-tile case (B=8) — matches the PyTorch module's (batch, 19) input.
    B = 8
    x = jax.random.normal(kx, (B, 19), jnp.float32)
    out = jax.block_until_ready(generator_forward(x, params))
    ref = _reference(x, params)
    assert out.shape == (B, 19)
    assert jnp.allclose(out, ref, atol=1e-2, rtol=1e-2)

    # Multi-tile case with ragged batch (exercises padding + multi-step grid).
    B2 = 300
    key, kx2 = jax.random.split(key)
    x2 = jax.random.normal(kx2, (B2, 19), jnp.float32)
    out2 = jax.block_until_ready(generator_forward(x2, params))
    ref2 = _reference(x2, params)
    assert out2.shape == (B2, 19)
    assert jnp.allclose(out2, ref2, atol=1e-2, rtol=1e-2)

    print("KERNEL_OK")
</pallas_src>

<mosaic_0001>
module attributes {stable_mosaic.version = 11 : i64} {
  func.func @_mlp_kernel(%arg0: i32, %arg1: memref<128x19xf32, #tpu.memory_space<vmem>>, %arg2: memref<64x19xbf16, #tpu.memory_space<vmem>>, %arg3: memref<64x1xf32, #tpu.memory_space<vmem>>, %arg4: memref<48x64xbf16, #tpu.memory_space<vmem>>, %arg5: memref<48x1xf32, #tpu.memory_space<vmem>>, %arg6: memref<19x48xbf16, #tpu.memory_space<vmem>>, %arg7: memref<19x1xf32, #tpu.memory_space<vmem>>, %arg8: memref<19x128xf32, #tpu.memory_space<vmem>>) attributes {dimension_semantics = [#tpu.dimension_semantics<parallel>], iteration_bounds = array<i64: 1>, scalar_prefetch = 0 : i64, scratch_operands = 0 : i64, tpu.core_type = #tpu.core_type<tc>, window_params = [{transform_indices = @transform_0, window_bounds = array<i64: 128, 19>}, {pipeline_mode = #tpu.pipeline_mode<synchronous>, transform_indices = @transform_1, window_bounds = array<i64: 64, 19>}, {pipeline_mode = #tpu.pipeline_mode<synchronous>, transform_indices = @transform_2, window_bounds = array<i64: 64, 1>}, {pipeline_mode = #tpu.pipeline_mode<synchronous>, transform_indices = @transform_3, window_bounds = array<i64: 48, 64>}, {pipeline_mode = #tpu.pipeline_mode<synchronous>, transform_indices = @transform_4, window_bounds = array<i64: 48, 1>}, {pipeline_mode = #tpu.pipeline_mode<synchronous>, transform_indices = @transform_5, window_bounds = array<i64: 19, 48>}, {pipeline_mode = #tpu.pipeline_mode<synchronous>, transform_indices = @transform_6, window_bounds = array<i64: 19, 1>}, {transform_indices = @transform_7, window_bounds = array<i64: 19, 128>}]} {
    %c0 = arith.constant 0 : index
    %c0_0 = arith.constant 0 : index
    %0 = vector.load %arg1[%c0, %c0_0] : memref<128x19xf32, #tpu.memory_space<vmem>>, vector<128x19xf32>
    %1 = arith.truncf %0 : vector<128x19xf32> to vector<128x19xbf16>
    %c0_1 = arith.constant 0 : index
    %c0_2 = arith.constant 0 : index
    %2 = vector.load %arg2[%c0_1, %c0_2] : memref<64x19xbf16, #tpu.memory_space<vmem>>, vector<64x19xbf16>
    %cst = arith.constant dense<0.000000e+00> : vector<64x128xf32>
    %3 = tpu.matmul %2, %1, %cst {dimension_numbers = #tpu.dot_dimension_numbers<[1], [1], [0], [0], [0, 0, 1, 0], [], []>} : vector<64x19xbf16>, vector<128x19xbf16>, vector<64x128xf32> -> vector<64x128xf32>
    %c0_3 = arith.constant 0 : index
    %c0_4 = arith.constant 0 : index
    %4 = vector.load %arg3[%c0_3, %c0_4] : memref<64x1xf32, #tpu.memory_space<vmem>>, vector<64x1xf32>
    %5 = vector.broadcast %4 : vector<64x1xf32> to vector<64x128xf32>
    %6 = arith.addf %3, %5 : vector<64x128xf32>
    %cst_5 = arith.constant 0.000000e+00 : f32
    %7 = vector.broadcast %cst_5 : f32 to vector<64x128xf32>
    %8 = arith.maximumf %6, %7 : vector<64x128xf32>
    %c0_6 = arith.constant 0 : index
    %c0_7 = arith.constant 0 : index
    %9 = vector.load %arg4[%c0_6, %c0_7] : memref<48x64xbf16, #tpu.memory_space<vmem>>, vector<48x64xbf16>
    %10 = arith.truncf %8 : vector<64x128xf32> to vector<64x128xbf16>
    %cst_8 = arith.constant dense<0.000000e+00> : vector<48x128xf32>
    %11 = tpu.matmul %9, %10, %cst_8 {dimension_numbers = #tpu.dot_dimension_numbers<[1], [0], [0], [1], [0, 0, 1, 1], [], []>} : vector<48x64xbf16>, vector<64x128xbf16>, vector<48x128xf32> -> vector<48x128xf32>
    %c0_9 = arith.constant 0 : index
    %c0_10 = arith.constant 0 : index
    %12 = vector.load %arg5[%c0_9, %c0_10] : memref<48x1xf32, #tpu.memory_space<vmem>>, vector<48x1xf32>
    %13 = vector.broadcast %12 : vector<48x1xf32> to vector<48x128xf32>
    %14 = arith.addf %11, %13 : vector<48x128xf32>
    %cst_11 = arith.constant 0.000000e+00 : f32
    %15 = vector.broadcast %cst_11 : f32 to vector<48x128xf32>
    %16 = arith.maximumf %14, %15 : vector<48x128xf32>
    %c0_12 = arith.constant 0 : index
    %c0_13 = arith.constant 0 : index
    %17 = vector.load %arg6[%c0_12, %c0_13] : memref<19x48xbf16, #tpu.memory_space<vmem>>, vector<19x48xbf16>
    %18 = arith.truncf %16 : vector<48x128xf32> to vector<48x128xbf16>
    %cst_14 = arith.constant dense<0.000000e+00> : vector<19x128xf32>
    %19 = tpu.matmul %17, %18, %cst_14 {dimension_numbers = #tpu.dot_dimension_numbers<[1], [0], [0], [1], [0, 0, 1, 1], [], []>} : vector<19x48xbf16>, vector<48x128xbf16>, vector<19x128xf32> -> vector<19x128xf32>
    %c0_15 = arith.constant 0 : index
    %c0_16 = arith.constant 0 : index
    %20 = vector.load %arg7[%c0_15, %c0_16] : memref<19x1xf32, #tpu.memory_space<vmem>>, vector<19x1xf32>
    %21 = vector.broadcast %20 : vector<19x1xf32> to vector<19x128xf32>
    %22 = arith.addf %19, %21 : vector<19x128xf32>
    %c0_17 = arith.constant 0 : index
    %c0_18 = arith.constant 0 : index
    %23 = vector.load %arg8[%c0_17, %c0_18] : memref<19x128xf32, #tpu.memory_space<vmem>>, vector<19x128xf32>
    tpu.vector_store %arg8[%c0_17, %c0_18], %22 {strides = array<i32>} : memref<19x128xf32, #tpu.memory_space<vmem>>, vector<19x128xf32>,
    return
  }
  func.func @transform_0(%arg0: i32) -> (i32, i32) {
    %c0_i32 = arith.constant 0 : i32
    %c0_i32_0 = arith.constant 0 : i32
    return %arg0, %c0_i32 : i32, i32
  }
  func.func @transform_1(%arg0: i32) -> (i32, i32) {
    %c0_i32 = arith.constant 0 : i32
    %c0_i32_0 = arith.constant 0 : i32
    %c0_i32_1 = arith.constant 0 : i32
    return %c0_i32, %c0_i32_0 : i32, i32
  }
  func.func @transform_2(%arg0: i32) -> (i32, i32) {
    %c0_i32 = arith.constant 0 : i32
    %c0_i32_0 = arith.constant 0 : i32
    %c0_i32_1 = arith.constant 0 : i32
    return %c0_i32, %c0_i32_0 : i32, i32
  }
  func.func @transform_3(%arg0: i32) -> (i32, i32) {
    %c0_i32 = arith.constant 0 : i32
    %c0_i32_0 = arith.constant 0 : i32
    %c0_i32_1 = arith.constant 0 : i32
    return %c0_i32, %c0_i32_0 : i32, i32
  }
  func.func @transform_4(%arg0: i32) -> (i32, i32) {
    %c0_i32 = arith.constant 0 : i32
    %c0_i32_0 = arith.constant 0 : i32
    %c0_i32_1 = arith.constant 0 : i32
    return %c0_i32, %c0_i32_0 : i32, i32
  }
  func.func @transform_5(%arg0: i32) -> (i32, i32) {
    %c0_i32 = arith.constant 0 : i32
    %c0_i32_0 = arith.constant 0 : i32
    %c0_i32_1 = arith.constant 0 : i32
    return %c0_i32, %c0_i32_0 : i32, i32
  }
  func.func @transform_6(%arg0: i32) -> (i32, i32) {
    %c0_i32 = arith.constant 0 : i32
    %c0_i32_0 = arith.constant 0 : i32
    %c0_i32_1 = arith.constant 0 : i32
    return %c0_i32, %c0_i32_0 : i32, i32
  }
  func.func @transform_7(%arg0: i32) -> (i32, i32) {
    %c0_i32 = arith.constant 0 : i32
    %c0_i32_0 = arith.constant 0 : i32
    return %c0_i32, %arg0 : i32, i32
  }
}

</mosaic_0001>

<bundles_post_ra>
// kernel: tpu_custom_call.1
= control target key start
LH: loop header
LB: loop body
LE: loop exit
PB: predicated region body
PF: predicated region fallthrough
CT: control target
= control target key end

     0   :  { %vm128_vm0 = vcmask 154624   ;;  %v623_v5 = vmov 0   ;;  %s832_s0 = inlined_call_operand.vmem [shape: f32[128,19], index: 0, kind: input, shape index: {}]   ;;  %s833_s1 = inlined_call_operand.vmem [shape: bf16[64,19], index: 1, kind: input, shape index: {}]   ;;  %s834_s2 = inlined_call_operand.vmem [shape: f32[64,1], index: 2, kind: input, shape index: {}]   ;;  %s835_s3 = inlined_call_operand.vmem [shape: bf16[48,64], index: 3, kind: input, shape index: {}]   ;;  %s836_s4 = inlined_call_operand.vmem [shape: f32[48,1], index: 4, kind: input, shape index: {}]   ;;  %s837_s5 = inlined_call_operand.vmem [shape: bf16[19,48], index: 5, kind: input, shape index: {}]   ;;  %s838_s6 = inlined_call_operand.vmem [shape: f32[19,1], index: 6, kind: input, shape index: {}]   ;;  %s839_s7 = inlined_call_operand.hbm [shape: f32[19,128], index: 7, kind: output, shape index: {}]  }
   0x1   :  { %v28_v0 = vld [vmem:[%s832_s0] sm:$0xff]  ;;  %v29_v1 = vld [vmem:[%s832_s0 + $0x8] sm:$0xff]  ;;  %v30_v2 = vld [vmem:[%s832_s0 + $0x10] sm:$0xff]  ;;  %588 = vset.pattern.permute.xlu0 %v623_v5  ;;  %589 = vset.pattern.permute.xlu1 %v623_v5 }
   0x2   :  { %v44_v3 = vpack.c.bf16 %v29_v1, %v28_v0  ;;  %v31_v4 = vld [vmem:[%s832_s0 + $0x18] sm:$0xff]  ;;  %v32_v8 = vld [vmem:[%s832_s0 + $0x20] sm:$0xff]  ;;  %v33_v9 = vld [vmem:[%s832_s0 + $0x28] sm:$0xff] }
   0x3   :  { %v45_v6 = vpack.c.bf16 %v31_v4, %v30_v2  ;;  %v590_v10 = vld [vmem:[%s833_s1] sm:$0xff]   ;;  %v46_v12 = vpack.c.bf16 %v33_v9, %v32_v8  ;;  %v62_v14 = vld [vmem:[%s834_s2 + $0x10] sm:$0xff]  ;;  %v61_v15 = vld [vmem:[%s834_s2 + $0x8] sm:$0xff] }
   0x4   :  { %574 = vmatprep.subr.msk.bf16.mxu0 %vm128_vm0, %v44_v3  ;;  %v142_v7 = vsel %vm128_vm0, %v44_v3, 0  ;;  %536 = vmatprep.mubr.msk.bf16.mxu0 %vm128_vm0, %v590_v10  ;;  %v60_v13 = vld [vmem:[%s834_s2] sm:$0xff]  ;;  %v63_v16 = vld [vmem:[%s834_s2 + $0x18] sm:$0xff]  ;;  %v34_v17 = vld [vmem:[%s832_s0 + $0x30] sm:$0xff] }
   0x5   :  { %521 = vmatpush3.bf16.xpose.msra.mxu0 %v142_v7  ;;  %v145_v11 = vsel %vm128_vm0, %v45_v6, 0  ;;  %70 = vperm.xlu0 %588, %v60_v13   ;;  %v148_v18 = vsel %vm128_vm0, %v46_v12, 0  ;;  %v35_v19 = vld [vmem:[%s832_s0 + $0x38] sm:$0xff]  ;;  %v64_v20 = vld [vmem:[%s834_s2 + $0x20] sm:$0xff]  ;;  %v65_v21 = vld [vmem:[%s834_s2 + $0x28] sm:$0xff] }
   0x6   :  { %575 = vmatprep.subr.msk.bf16.mxu0 %vm128_vm0, %v45_v6  ;;  %80 = vperm.xlu1 %589, %v62_v14   ;;  %v47_v22 = vpack.c.bf16 %v35_v19, %v34_v17 }
   0x9   :  { %75 = vperm.xlu0 %588, %v61_v15  }
   0xa   :  { %85 = vperm.xlu1 %589, %v63_v16  }
   0xd   :  { %523 = vmatpush3.bf16.xpose.msra.mxu0 %v145_v11  ;;  %90 = vperm.xlu0 %588, %v64_v20  }
   0xe   :  { %576 = vmatprep.subr.msk.bf16.mxu0 %vm128_vm0, %v46_v12 }
   0xf   :  { %12 = vsyncpa [#allocation3], 0  ;;  %v66_v23 = vld [vmem:[%s834_s2 + $0x30] sm:$0xff]  ;;  %95 = vperm.xlu1 %589, %v65_v21   ;;  %v67_v24 = vld [vmem:[%s834_s2 + $0x38] sm:$0xff]  ;;  %v151_v29 = vsel %vm128_vm0, %v47_v22, 0  ;;  %v624_v54 = vmov 0.0  }
  0x10   :  { %v36_v25 = vld [vmem:[%s832_s0 + $0x40] sm:$0xff]  ;;  %v37_v26 = vld [vmem:[%s832_s0 + $0x48] sm:$0xff]  ;;  %v250_v31 = vld [vmem:[%s836_s4 + $0x10] sm:$0xff]  ;;  %544 = vmatprep.subr.bf16.mxu1 %v624_v54  ;;  %vm625_vm1 = vmmov 0   ;;  %vm299_vm2 = vcmask 523264   ;;  %vm404_vm3 = vcmask 392192  }
  0x11   :  { %100 = vperm.xlu0 %588, %v66_v23   ;;  %v248_v27 = vld [vmem:[%s836_s4] sm:$0xff]  ;;  %v249_v28 = vld [vmem:[%s836_s4 + $0x8] sm:$0xff]  ;;  %v48_v30 = vpack.c.bf16 %v37_v26, %v36_v25  ;;  %v251_v32 = vld [vmem:[%s836_s4 + $0x18] sm:$0xff]  ;;  %552 = vmatprep.mubr.msk.bf16.mxu1 %vm625_vm1, %v624_v54  ;;  %s626_s9 = smov [#allocation2]  }
  0x12   :  { %v38_v33 = vld [vmem:[%s832_s0 + $0x50] sm:$0xff]  ;;  %v39_v34 = vld [vmem:[%s832_s0 + $0x58] sm:$0xff]  ;;  %v252_v35 = vld [vmem:[%s836_s4 + $0x20] sm:$0xff]  ;;  %s467_s10 = sshll.u32 %s626_s9, 4  ;;  %s468_s10 = int_to_ptr.vmem [resolvable:$true] %s467_s10 }
  0x13   :  { %105 = vperm.xlu1 %589, %v67_v24   ;;  %v253_v36 = vld [vmem:[%s836_s4 + $0x28] sm:$0xff]  ;;  %v154_v37 = vsel %vm128_vm0, %v48_v30, 0  ;;  %v49_v38 = vpack.c.bf16 %v39_v34, %v38_v33  ;;  %v378_v39 = vld [vmem:[%s838_s6] sm:$0xff]  ;;  %v380_v43 = vld [vmem:[%s838_s6 + $0x10] sm:$0x7]  ;;  %p604_p1 = scmp.lt.s32.totalorder %s468_s10, %s468_s10 }
  0x14   :  { %v379_v40 = vld [vmem:[%s838_s6 + $0x8] sm:$0xff]  ;;  %v40_v41 = vld [vmem:[%s832_s0 + $0x60] sm:$0xff]  ;;  %v42_v46 = vld [vmem:[%s832_s0 + $0x70] sm:$0xff] }
  0x15   :  { %525 = vmatpush3.bf16.xpose.msra.mxu0 %v148_v18  ;;  %256 = vperm.xlu0 %588, %v248_v27   ;;  %v41_v42 = vld [vmem:[%s832_s0 + $0x68] sm:$0xff]  ;;  %v157_v44 = vsel %vm128_vm0, %v49_v38, 0  ;;  %v43_v47 = vld [vmem:[%s832_s0 + $0x78] sm:$0xff]  ;;  %v592_v52 = vld [vmem:[%s833_s1 + $0x10] sm:$0xff]  }
  0x16   :  { %577 = vmatprep.subr.msk.bf16.mxu0 %vm128_vm0, %v47_v22  ;;  %v50_v45 = vpack.c.bf16 %v41_v42, %v40_v41  ;;  %v51_v49 = vpack.c.bf16 %v43_v47, %v42_v46  ;;  %v591_v51 = vld [vmem:[%s833_s1 + $0x8] sm:$0xff]   ;;  %v593_v53 = vld [vmem:[%s833_s1 + $0x18] sm:$0xff]   ;;  %v594_v27 = vld [vmem:[%s835_s3] sm:$0xff]  }
  0x17   :  { %261 = vperm.xlu1 %589, %v249_v28   ;;  %v595_v28 = vld [vmem:[%s835_s3 + $0x8] sm:$0xff]  }
  0x18   :  { %v160_v48 = vsel %vm128_vm0, %v50_v45, 0  ;;  %v163_v50 = vsel %vm128_vm0, %v51_v49, 0 }
  0x19   :  { %266 = vperm.xlu0 %588, %v250_v31  }
  0x1b   :  { %271 = vperm.xlu1 %589, %v251_v32  }
  0x1d   :  { %527 = vmatpush3.bf16.xpose.msra.mxu0 %v151_v29  ;;  %276 = vperm.xlu0 %588, %v252_v35   ;;  %v596_v29 = vld [vmem:[%s835_s3 + $0x10] sm:$0xff]  }
  0x1e   :  { %578 = vmatprep.subr.msk.bf16.mxu0 %vm128_vm0, %v48_v30  ;;  %v597_v30 = vld [vmem:[%s837_s5] sm:$0xff]  }
  0x1f   :  { %281 = vperm.xlu1 %589, %v253_v36  }
  0x21   :  { %383 = vperm.xlu0 %588, %v378_v39  }
  0x23   :  { %388 = vperm.xlu1 %589, %v379_v40  }
  0x25   :  { %529 = vmatpush3.bf16.xpose.msra.mxu0 %v154_v37  ;;  %393 = vperm.xlu0 %588, %v380_v43  }
  0x26   :  { %579 = vmatprep.subr.msk.bf16.mxu0 %vm128_vm0, %v49_v38 }
  0x2d   :  { %531 = vmatpush3.bf16.xpose.msra.mxu0 %v157_v44 }
  0x2e   :  { %580 = vmatprep.subr.msk.bf16.mxu0 %vm128_vm0, %v50_v45 }
  0x35   :  { %533 = vmatpush3.bf16.xpose.msra.mxu0 %v160_v48 }
  0x36   :  { %581 = vmatprep.subr.msk.bf16.mxu0 %vm128_vm0, %v51_v49 }
  0x3d   :  { %535 = vmatpush3.bf16.xpose.msra.mxu0 %v163_v50 }
  0x44   :  { %537 = vmatmul.mubr.msk.bf16.vlgmr.msra.gmra.mrb[0].mxu0 %vm128_vm0, %v591_v51 }
  0x45   :  { %540 = vmatprep.mubr.msk.bf16.mxu0 %vm128_vm0, %v592_v52 }
  0x4c   :  { %541 = vmatmul.mubr.msk.bf16.gmra.mrb[4].mxu0 %vm128_vm0, %v593_v53 }
  0x84   :  { %v71_v55 = vpop.permute.xlu0 %70 }
  0x85   :  { %v81_v56 = vpop.permute.xlu1 %80 }
  0x88   :  { %v76_v57 = vpop.permute.xlu0 %75 }
  0x89   :  { %v86_v58 = vpop.permute.xlu1 %85 }
  0x8c   :  { %v91_v62 = vpop.permute.xlu0 %90 }
  0x8e   :  { %v96_v3 = vpop.permute.xlu1 %95 }
  0x90   :  { %v101_v10 = vpop.permute.xlu0 %100 }
  0x92   :  { %v106_v15 = vpop.permute.xlu1 %105 }
  0x94   :  { %v257_v31 = vpop.permute.xlu0 %256 }
  0x96   :  { %v262_v35 = vpop.permute.xlu1 %261 }
  0x98   :  { %v267_v42 = vpop.permute.xlu0 %266 }
  0x9a   :  { %v272_v46 = vpop.permute.xlu1 %271 }
  0x9c   :  { %v277_v53 = vpop.permute.xlu0 %276 }
 0x117   :  { %v538_v59 = vpop.f32.mrb[0].mxu0 }
 0x118   :  { %v208_v60 = vadd.f32 %v538_v59, %v81_v56  ;;  %v199_v61 = vpop.f32.mrb[1].mxu0 }
 0x119   :  { %v200_v63 = vadd.f32 %v199_v61, %v71_v55  ;;  %v539_v0 = vpop.f32.mrb[2].mxu0 }
 0x11a   :  { %v211_v1 = vadd.f32 %v539_v0, %v86_v58  ;;  %v202_v2 = vpop.f32.mrb[3].mxu0  ;;  %v232_v5 = vmax.f32 %v208_v60, 0.0  ;;  %v598_v0 = vld [vmem:[%s837_s5 + $0x8] ss:$0 sps:$4 sm:$0x33]   ;;  %s599_s5 = scalar_lea.vmem %s468_s10, 384 }
 0x11b   :  { %v203_v4 = vadd.f32 %v202_v2, %v76_v57  ;;  %v230_v7 = vmax.f32 %v200_v63, 0.0  ;;  %v282_v57 = vpop.permute.xlu1 %281  ;;  %p600_p0 = scmp.ne.s32.totalorder %s468_s10, %s599_s5  ;;  %p605_p2 = scmp.lt.s32.totalorder %s599_s5, %s599_s5 }
 0x11c   :  { %v233_v6 = vmax.f32 %v211_v1, 0.0  ;;  %v384_v1 = vpop.permute.xlu0 %383 }
 0x11d   :  { %v231_v8 = vmax.f32 %v203_v4, 0.0  ;;  %p606_p3 = por %p605_p2, %p604_p1 }
 0x11e   :  { %v245_v9 = vpack.c.bf16 %v233_v6, %v232_v5 }
 0x11f   :  { %v542_v11 = vpop.f32.mrb[4].mxu0  ;;  %v244_v12 = vpack.c.bf16 %v231_v8, %v230_v7  ;;  %v389_v8 = vpop.permute.xlu1 %388  ;;  %p607_p4 = pnand %p606_p3, %p600_p0 }
 0x120   :  { %v224_v13 = vadd.f32 %v542_v11, %v101_v10  ;;  %v215_v14 = vpop.f32.mrb[5].mxu0  ;;  %v394_v2 = vpop.permute.xlu0 %393 }
 0x121   :  { %v216_v16 = vadd.f32 %v215_v14, %v91_v62  ;;  %v543_v17 = vpop.f32.mrb[6].mxu0  ;;  %545 = vmatpush3.bf16.msra.mxu1 %v244_v12 }
 0x122   :  { %v227_v18 = vadd.f32 %v543_v17, %v106_v15  ;;  %v218_v19 = vpop.f32.mrb[7].mxu0  ;;  %546 = vmatprep.subr.bf16.mxu1 %v624_v54  ;;  %v236_v21 = vmax.f32 %v224_v13, 0.0 }
 0x123   :  { %v219_v20 = vadd.f32 %v218_v19, %v96_v3  ;;  %v234_v23 = vmax.f32 %v216_v16, 0.0 }
 0x124   :  { %v237_v22 = vmax.f32 %v227_v18, 0.0 }
 0x125   :  { %v235_v24 = vmax.f32 %v219_v20, 0.0  ;;  %547 = vmatpush3.bf16.msra.mxu1 %v245_v9 }
 0x126   :  { %v247_v25 = vpack.c.bf16 %v237_v22, %v236_v21  ;;  %548 = vmatprep.subr.bf16.mxu1 %v624_v54 }
 0x127   :  { %v246_v26 = vpack.c.bf16 %v235_v24, %v234_v23 }
 0x129   :  { %549 = vmatpush3.bf16.msra.mxu1 %v246_v26 }
 0x12a   :  { %550 = vmatprep.subr.bf16.mxu1 %v624_v54 }
 0x12d   :  { %551 = vmatpush3.bf16.msra.mxu1 %v247_v25 }
 0x130   :  { %553 = vmatmul.mubr.msk.bf16.vlgmr.msra.gmra.mrb[0].mxu1 %vm299_vm2, %v594_v27 }
 0x131   :  { %556 = vmatprep.mubr.msk.bf16.mxu1 %vm625_vm1, %v624_v54 }
 0x138   :  { %557 = vmatmul.mubr.msk.bf16.gmra.mrb[4].mxu1 %vm299_vm2, %v595_v28 }
 0x139   :  { %560 = vmatprep.mubr.msk.bf16.mxu1 %vm625_vm1, %v624_v54 }
 0x140   :  { %561 = vmatmul.mubr.msk.bf16.gmra.mrb[8].mxu1 %vm299_vm2, %v596_v29 }
 0x141   :  { %570 = vmatprep.mubr.msk.bf16.mxu1 %vm404_vm3, %v597_v30 }
 0x203   :  { %v343_v32 = vpop.f32.mrb[0].mxu1 }
 0x204   :  { %v344_v33 = vadd.f32 %v343_v32, %v257_v31  ;;  %v554_v34 = vpop.f32.mrb[1].mxu1 }
 0x205   :  { %v346_v36 = vpop.f32.mrb[2].mxu1 }
 0x206   :  { %v347_v37 = vadd.f32 %v346_v36, %v262_v35  ;;  %v555_v38 = vpop.f32.mrb[3].mxu1  ;;  %v366_v39 = vmax.f32 %v344_v33, 0.0 }
 0x208   :  { %v367_v40 = vmax.f32 %v347_v37, 0.0 }
 0x20a   :  { %v375_v41 = vpack.c.bf16 %v367_v40, %v366_v39 }
 0x20b   :  { %v351_v43 = vpop.f32.mrb[4].mxu1 }
 0x20c   :  { %v352_v44 = vadd.f32 %v351_v43, %v267_v42  ;;  %v558_v45 = vpop.f32.mrb[5].mxu1  ;;  %564 = vmatprep.subr.bf16.mxu1 %v375_v41 }
 0x20d   :  { %v354_v47 = vpop.f32.mrb[6].mxu1  ;;  %565 = vmatpush3.bf16.msra.mxu1 %v375_v41 }
 0x20e   :  { %v355_v48 = vadd.f32 %v354_v47, %v272_v46  ;;  %v559_v49 = vpop.f32.mrb[7].mxu1  ;;  %v368_v50 = vmax.f32 %v352_v44, 0.0 }
 0x210   :  { %v369_v51 = vmax.f32 %v355_v48, 0.0 }
 0x212   :  { %v376_v52 = vpack.c.bf16 %v369_v51, %v368_v50 }
 0x213   :  { %v359_v54 = vpop.f32.mrb[8].mxu1 }
 0x214   :  { %v360_v55 = vadd.f32 %v359_v54, %v277_v53  ;;  %v562_v56 = vpop.f32.mrb[9].mxu1  ;;  %566 = vmatprep.subr.bf16.mxu1 %v376_v52 }
 0x215   :  { %v362_v58 = vpop.f32.mrb[10].mxu1  ;;  %567 = vmatpush3.bf16.msra.mxu1 %v376_v52 }
 0x216   :  { %v363_v59 = vadd.f32 %v362_v58, %v282_v57  ;;  %v563_v60 = vpop.f32.mrb[11].mxu1  ;;  %v370_v61 = vmax.f32 %v360_v55, 0.0 }
 0x218   :  { %v371_v62 = vmax.f32 %v363_v59, 0.0 }
 0x21a   :  { %v377_v63 = vpack.c.bf16 %v371_v62, %v370_v61 }
 0x21c   :  { %568 = vmatprep.subr.bf16.mxu1 %v377_v63 }
 0x21d   :  { %569 = vmatpush3.bf16.msra.mxu1 %v377_v63 }
 0x220   :  { %571 = vmatmul.mubr.msk.bf16.vlgmr.msra.gmra.mrb[12].mxu1 %vm404_vm3, %v598_v0 }
 0x2f3   :  { %v572_v3 = vpop.f32.mrb[12].mxu1 }
 0x2f4   :  { %v454_v4 = vadd.f32 %v572_v3, %v394_v2  ;;  %v445_v5 = vpop.f32.mrb[13].mxu1 }
 0x2f5   :  { %v446_v6 = vadd.f32 %v445_v5, %v384_v1  ;;  %v573_v7 = vpop.f32.mrb[14].mxu1 }
 0x2f6   :  { %461 = vst [vmem:[#allocation2 + $0x10] sm:$0x7] %v454_v4  ;;  %v448_v9 = vpop.f32.mrb[15].mxu1 }
 0x2f7   :  { %459 = vst [vmem:[#allocation2] sm:$0xff] %v446_v6  ;;  %v449_v10 = vadd.f32 %v448_v9, %v389_v8 }
 0x2f9   :  { %460 = vst [vmem:[#allocation2 + $0x8] sm:$0xff] %v449_v10 }
 0x2fa   :  { %610 = shalt.err (!%p607_p4)
}
 0x2fb   :  { %s611_s13 = scalar_lea.hbm %s839_s7, 384 }
 0x2fc   :  { %p612_p5 = scmp.ne.s32.totalorder %s839_s7, %s611_s13  ;;  %p615_p6 = scmp.lt.u32.totalorder %s611_s13, %s839_s7 }
 0x2fe   :  { %p617_p7 = pnand %p615_p6, %p612_p5 }
 0x300   :  { %620 = shalt.err (!%p617_p7)
}
 0x301   :  { %s627_s17 = smov 128   ;;  %s628_s18 = smov 8  }
 0x302   :  { %473 = dma.vmem_to_hbm [thread:$0]  %s468_s10, 384, %s839_s7, [#allocation3], %s627_s17, %s627_s17, %s628_s18  }
 0x303   :  { %621 = dma.done.wait [#allocation3], 384  }
 0x304   :  { %622 = vsyncadd [#allocation3], 4294966912 }
 0x305   :  { %477 = vsyncpa [#allocation3], 1 }

</bundles_post_ra>
